<compile_context>
chip_gen: v6e
topology: v6e:2x2x1
jax: 0.10.0
libtpu: 0.0.40
codegen_flags: <defaults>
</compile_context>

<pallas_src>
import functools
import math

import jax
import jax.numpy as jnp
from jax.experimental import pallas as pl
from jax.experimental.pallas import tpu as pltpu

_LANES = 128                       # vreg lane width
_SUBLANES = 8                      # f32 sublanes per vreg
_MAX_TILE_ROWS = 6144              # ~3 MiB per input block (use ~3072 on v5e)
_VMEM_LIMIT_BYTES = 48 * 1024 * 1024


def _num_tensorcores():
    """Best-effort TensorCore count per chip (2 on v7x, 1 on v5e/v6e)."""
    try:
        info = pltpu.get_tpu_info()
    except Exception:
        return 1
    for name in ("num_tensorcores", "tensorcore_count", "num_cores",
                 "cores_per_chip"):
        v = getattr(info, name, None)
        if v is None:
            continue
        try:
            v = int(v)
        except (TypeError, ValueError):
            continue
        if v >= 1:
            return min(v, 2)
    return 1


def _weighted_mse_kernel(pred_ref, actual_ref, w_ref, out_ref, acc_ref, *,
                         steps_per_core, last_block, tail_rows):
    c = pl.program_id(0)                      # core-split axis ("parallel")
    s = pl.program_id(1)                      # reduction axis ("arbitrary")
    blk = c * steps_per_core + s

    @pl.when(s == 0)
    def _init():
        acc_ref[...] = jnp.zeros_like(acc_ref)

    def _accumulate(mask_tail):
        d = pred_ref[...].astype(jnp.float32) - actual_ref[...].astype(jnp.float32)
        contrib = d * d * w_ref[...]
        if mask_tail:
            # Overhang rows of the genuine last partial block hold stale VMEM
            # (possibly Inf/NaN): use a true select, never multiply-by-mask.
            row = jax.lax.broadcasted_iota(jnp.int32, contrib.shape, 0)
            contrib = jnp.where(row < tail_rows, contrib, 0.0)
        # Fold the whole tile into a single (8, 128) accumulator (no full-tile
        # accumulator RMW, tiny finalize reduce).
        acc_ref[...] += contrib.reshape(-1, _SUBLANES, _LANES).sum(axis=0)

    if tail_rows is None:
        # Every real block is full: single mask-free path.
        @pl.when(blk <= last_block)
        def _full_blocks():
            _accumulate(mask_tail=False)
    else:
        @pl.when(blk < last_block)
        def _interior_blocks():
            _accumulate(mask_tail=False)

        @pl.when(blk == last_block)
        def _tail_block():
            _accumulate(mask_tail=True)

    @pl.when(s == pl.num_programs(1) - 1)
    def _finalize():
        out_ref[0, 0] = jnp.sum(acc_ref[...])


def weighted_mse_loss(pred, actual, force_weight=1.0, torque_weight=1.0, *,
                      max_tile_rows=_MAX_TILE_ROWS, num_cores=None):
    """force_weight * MSE(pred[:, :3], actual[:, :3])
       + torque_weight * MSE(pred[:, 3:], actual[:, 3:])"""
    assert pred.shape == actual.shape
    B, C = pred.shape
    assert C > 3, "need at least 4 channels (3 force + >=1 torque)"

    try:
        # weight / element-count folded into one per-channel scale.
        force_scale = float(force_weight) / float(B * 3)
        torque_scale = float(torque_weight) / float(B * (C - 3))
    except (TypeError, jax.errors.ConcretizationTypeError) as e:
        raise TypeError(
            "force_weight / torque_weight must be static Python scalars; they "
            "are folded into the kernel's per-channel scale at trace time.") from e

    n = B * C

    # Lane-dense view: row-major flatten (free), rows rounded to a multiple of
    # 8 so every block and the (8,128) fold are sublane-aligned.
    # TODO(synk): for ragged n the jnp.pad below materializes padded copies of
    # both inputs (extra HBM traffic); large-B callers should keep B*C a
    # multiple of 1024 so the reshape is free (the `if pad:` branch is skipped).
    rows_p = pl.cdiv(n, _SUBLANES * _LANES) * _SUBLANES
    pad = rows_p * _LANES - n
    pred_f = pred.reshape(-1)
    actual_f = actual.reshape(-1)
    if pad:
        # Zero padding on both operands -> zero diff -> zero contribution.
        pred_f = jnp.pad(pred_f, (0, pad))
        actual_f = jnp.pad(actual_f, (0, pad))
    pred2 = pred_f.reshape(rows_p, _LANES)
    actual2 = actual_f.reshape(rows_p, _LANES)

    # Tile rows: multiple of 8 (sublanes) and of C/gcd(C,128) so the flat
    # channel pattern (hence the weight tile) is identical for every block.
    # Single-block inputs just use the whole array.
    period = C // math.gcd(C, _LANES)
    align = (_SUBLANES * period) // math.gcd(_SUBLANES, period)   # lcm(8, period)
    tile_rows = max(align, (max_tile_rows // align) * align)
    if rows_p <= tile_rows:
        tile_rows = rows_p

    total_blocks = pl.cdiv(rows_p, tile_rows)
    last_block = total_blocks - 1
    tail = rows_p - last_block * tile_rows
    tail_rows = None if tail == tile_rows else tail   # None => all blocks full

    if num_cores is None:
        num_cores = _num_tensorcores()
    num_cores = max(1, min(int(num_cores), total_blocks))
    steps_per_core = pl.cdiv(total_blocks, num_cores)

    # Precomputed per-element weight tile (scales folded in); constant
    # index_map -> DMA'd once and kept resident in VMEM.
    flat = (jax.lax.broadcasted_iota(jnp.int32, (tile_rows, _LANES), 0) * _LANES
            + jax.lax.broadcasted_iota(jnp.int32, (tile_rows, _LANES), 1))
    w_tile = jnp.where(flat % C < 3, jnp.float32(force_scale),
                       jnp.float32(torque_scale))

    def in_map(c, s):
        # Redundant trailing steps clamp to the core's previous block so their
        # DMA degenerates to a revisit; their compute is skipped via pl.when.
        return (jnp.minimum(c * steps_per_core + s, last_block), 0)

    kernel = functools.partial(
        _weighted_mse_kernel,
        steps_per_core=steps_per_core,
        last_block=last_block,
        tail_rows=tail_rows,
    )

    partials = pl.pallas_call(
        kernel,
        out_shape=jax.ShapeDtypeStruct((num_cores, 1), jnp.float32),
        grid_spec=pltpu.PrefetchScalarGridSpec(
            num_scalar_prefetch=0,
            grid=(num_cores, steps_per_core),
            in_specs=[
                pl.BlockSpec((tile_rows, _LANES), in_map),
                pl.BlockSpec((tile_rows, _LANES), in_map),
                pl.BlockSpec((tile_rows, _LANES), lambda c, s: (0, 0)),
            ],
            out_specs=pl.BlockSpec((1, 1), lambda c, s: (c, 0),
                                   memory_space=pltpu.SMEM),
            scratch_shapes=[pltpu.VMEM((_SUBLANES, _LANES), jnp.float32)],
        ),
        compiler_params=pltpu.CompilerParams(
            dimension_semantics=("parallel", "arbitrary"),
            vmem_limit_bytes=_VMEM_LIMIT_BYTES,
        ),
    )(pred2, actual2, w_tile)

    # Per-core partial sums added outside the kernel.
    return jnp.sum(partials)


def _reference(pred, actual, force_weight=1.0, torque_weight=1.0):
    fp, fa = pred[:, :3], actual[:, :3]
    tp, ta = pred[:, 3:], actual[:, 3:]
    return (force_weight * jnp.mean((fp - fa) ** 2)
            + torque_weight * jnp.mean((tp - ta) ** 2))


if __name__ == "__main__":
    key = jax.random.PRNGKey(0)

    cases = [
        # (B, C, force_w, torque_w, max_tile_rows, num_cores)
        (8, 6, 1.0, 1.0, _MAX_TILE_ROWS, None),   # tiny, single block, padded tail
        (37, 7, 2.5, 0.5, _MAX_TILE_ROWS, None),  # odd C, padded tail
        (512, 8, 1.0, 3.0, 8, None),              # pad-free, multi-block, even split
        (1200, 6, 0.7, 1.3, 24, 2),               # multi-block, partial tail, core split
    ]

    for idx, (B, C, fw, tw, mtr, nc) in enumerate(cases):
        k1, k2 = jax.random.split(jax.random.fold_in(key, idx))
        pred = jax.random.normal(k1, (B, C), dtype=jnp.float32)
        actual = jax.random.normal(k2, (B, C), dtype=jnp.float32)

        loss = weighted_mse_loss(pred, actual, fw, tw,
                                 max_tile_rows=mtr, num_cores=nc)
        loss = jax.block_until_ready(loss)

        ref = _reference(pred, actual, fw, tw)
        assert jnp.allclose(loss, ref, rtol=1e-5, atol=1e-6), (
            (B, C, fw, tw), loss, ref)

    print("KERNEL_OK")
</pallas_src>

<mosaic_0001>
module attributes {stable_mosaic.version = 11 : i64} {
  func.func @_weighted_mse_kernel(%arg0: i32, %arg1: i32, %arg2: memref<8x128xf32, #tpu.memory_space<vmem>>, %arg3: memref<8x128xf32, #tpu.memory_space<vmem>>, %arg4: memref<8x128xf32, #tpu.memory_space<vmem>>, %arg5: memref<1x1xf32, #tpu.memory_space<smem>>, %arg6: memref<8x128xf32, #tpu.memory_space<vmem>>) attributes {dimension_semantics = [#tpu.dimension_semantics<parallel>, #tpu.dimension_semantics<arbitrary>], iteration_bounds = array<i64: 1, 1>, scalar_prefetch = 0 : i64, scratch_operands = 1 : i64, tpu.core_type = #tpu.core_type<tc>, window_params = [{transform_indices = @transform_0, window_bounds = array<i64: 8, 128>}, {transform_indices = @transform_1, window_bounds = array<i64: 8, 128>}, {pipeline_mode = #tpu.pipeline_mode<synchronous>, transform_indices = @transform_2, window_bounds = array<i64: 8, 128>}, {transform_indices = @transform_3, window_bounds = array<i64: 1, 1>}]} {
    %c1_i32 = arith.constant 1 : i32
    %0 = arith.muli %arg0, %c1_i32 : i32
    %1 = arith.addi %0, %arg1 : i32
    %c0_i32 = arith.constant 0 : i32
    %2 = arith.cmpi eq, %arg1, %c0_i32 : i32
    %3 = arith.extui %2 : i1 to i32
    %c0_i32_0 = arith.constant 0 : i32
    %4 = arith.cmpi ne, %3, %c0_i32_0 : i32
    scf.if %4 {
      %cst = arith.constant 0.000000e+00 : f32
      %11 = vector.broadcast %cst : f32 to vector<8x128xf32>
      %c0 = arith.constant 0 : index
      %c0_5 = arith.constant 0 : index
      %12 = vector.load %arg6[%c0, %c0_5] : memref<8x128xf32, #tpu.memory_space<vmem>>, vector<8x128xf32>
      tpu.vector_store %arg6[%c0, %c0_5], %11 {strides = array<i32>} : memref<8x128xf32, #tpu.memory_space<vmem>>, vector<8x128xf32>,
    } else {
    }
    %c0_i32_1 = arith.constant 0 : i32
    %5 = arith.cmpi sle, %1, %c0_i32_1 : i32
    %6 = arith.extui %5 : i1 to i32
    %c0_i32_2 = arith.constant 0 : i32
    %7 = arith.cmpi ne, %6, %c0_i32_2 : i32
    scf.if %7 {
      %c0 = arith.constant 0 : index
      %c0_5 = arith.constant 0 : index
      %11 = vector.load %arg2[%c0, %c0_5] : memref<8x128xf32, #tpu.memory_space<vmem>>, vector<8x128xf32>
      %c0_6 = arith.constant 0 : index
      %c0_7 = arith.constant 0 : index
      %12 = vector.load %arg3[%c0_6, %c0_7] : memref<8x128xf32, #tpu.memory_space<vmem>>, vector<8x128xf32>
      %13 = arith.subf %11, %12 : vector<8x128xf32>
      %14 = arith.mulf %13, %13 : vector<8x128xf32>
      %c0_8 = arith.constant 0 : index
      %c0_9 = arith.constant 0 : index
      %15 = vector.load %arg4[%c0_8, %c0_9] : memref<8x128xf32, #tpu.memory_space<vmem>>, vector<8x128xf32>
      %16 = arith.mulf %14, %15 : vector<8x128xf32>
      %c0_10 = arith.constant 0 : index
      %c0_11 = arith.constant 0 : index
      %17 = vector.load %arg6[%c0_10, %c0_11] : memref<8x128xf32, #tpu.memory_space<vmem>>, vector<8x128xf32>
      %18 = vector.shape_cast %16 : vector<8x128xf32> to vector<1x8x128xf32>
      %cst = arith.constant dense<0.000000e+00> : vector<8x128xf32>
      %19 = vector.multi_reduction <add>, %18, %cst [0] : vector<1x8x128xf32> to vector<8x128xf32>
      %20 = arith.addf %17, %19 : vector<8x128xf32>
      %c0_12 = arith.constant 0 : index
      %c0_13 = arith.constant 0 : index
      %21 = vector.load %arg6[%c0_12, %c0_13] : memref<8x128xf32, #tpu.memory_space<vmem>>, vector<8x128xf32>
      tpu.vector_store %arg6[%c0_12, %c0_13], %20 {strides = array<i32>} : memref<8x128xf32, #tpu.memory_space<vmem>>, vector<8x128xf32>,
    } else {
    }
    %c0_i32_3 = arith.constant 0 : i32
    %8 = arith.cmpi eq, %arg1, %c0_i32_3 : i32
    %9 = arith.extui %8 : i1 to i32
    %c0_i32_4 = arith.constant 0 : i32
    %10 = arith.cmpi ne, %9, %c0_i32_4 : i32
    scf.if %10 {
      %c0 = arith.constant 0 : index
      %c0_5 = arith.constant 0 : index
      %11 = vector.load %arg6[%c0, %c0_5] : memref<8x128xf32, #tpu.memory_space<vmem>>, vector<8x128xf32>
      %12 = vector.shape_cast %11 : vector<8x128xf32> to vector<1x8x128xf32>
      %cst = arith.constant dense<0.000000e+00> : vector<1xf32>
      %13 = vector.multi_reduction <add>, %12, %cst [1, 2] : vector<1x8x128xf32> to vector<1xf32>
      %14 = vector.shape_cast %13 : vector<1xf32> to vector<1x1x1xf32>
      %15 = vector.extract %14[0, 0, 0] : f32 from vector<1x1x1xf32>
      %c0_6 = arith.constant 0 : index
      %c0_7 = arith.constant 0 : index
      %16 = memref.load %arg5[%c0_6, %c0_7] : memref<1x1xf32, #tpu.memory_space<smem>>
      memref.store %15, %arg5[%c0_6, %c0_7] : memref<1x1xf32, #tpu.memory_space<smem>>
    } else {
    }
    return
  }
  func.func @transform_0(%arg0: i32, %arg1: i32) -> (i32, i32) {
    %c1_i32 = arith.constant 1 : i32
    %0 = arith.muli %arg0, %c1_i32 : i32
    %1 = arith.addi %0, %arg1 : i32
    %c0_i32 = arith.constant 0 : i32
    %2 = arith.minsi %1, %c0_i32 : i32
    %c0_i32_0 = arith.constant 0 : i32
    %c0_i32_1 = arith.constant 0 : i32
    return %2, %c0_i32_0 : i32, i32
  }
  func.func @transform_1(%arg0: i32, %arg1: i32) -> (i32, i32) {
    %c1_i32 = arith.constant 1 : i32
    %0 = arith.muli %arg0, %c1_i32 : i32
    %1 = arith.addi %0, %arg1 : i32
    %c0_i32 = arith.constant 0 : i32
    %2 = arith.minsi %1, %c0_i32 : i32
    %c0_i32_0 = arith.constant 0 : i32
    %c0_i32_1 = arith.constant 0 : i32
    return %2, %c0_i32_0 : i32, i32
  }
  func.func @transform_2(%arg0: i32, %arg1: i32) -> (i32, i32) {
    %c0_i32 = arith.constant 0 : i32
    %c0_i32_0 = arith.constant 0 : i32
    %c0_i32_1 = arith.constant 0 : i32
    return %c0_i32, %c0_i32_0 : i32, i32
  }
  func.func @transform_3(%arg0: i32, %arg1: i32) -> (i32, i32) {
    %c0_i32 = arith.constant 0 : i32
    %c0_i32_0 = arith.constant 0 : i32
    return %arg0, %c0_i32 : i32, i32
  }
}

</mosaic_0001>

<bundles_post_ra>
// kernel: tpu_custom_call.1
= control target key start
LH: loop header
LB: loop body
LE: loop exit
PB: predicated region body
PF: predicated region fallthrough
CT: control target
= control target key end

     0   :  { %8 = vsyncpa [#allocation4], 0  ;;  %s236_s0 = inlined_call_operand.hbm [shape: f32[8,128], index: 0, kind: input, shape index: {}]   ;;  %s237_s1 = inlined_call_operand.hbm [shape: f32[8,128], index: 1, kind: input, shape index: {}]   ;;  %s238_s2 = inlined_call_operand.hbm [shape: f32[8,128], index: 2, kind: input, shape index: {}]   ;;  %s239_s3 = inlined_call_operand.hbm [shape: f32[1,1], index: 3, kind: output, shape index: {}]  }
   0x1   :  { %9 = vsyncpa [#allocation7], 0 }
   0x2   :  { %10 = vsyncpa [#allocation5], 0  ;;  %s200_s12 = smov [#allocation6]   ;;  %s201_s14 = smov [#allocation3]  }
   0x3   :  { %s37_s13 = sshll.u32 %s200_s12, 4  ;;  %s22_s15 = sshll.u32 %s201_s14, 4  ;;  %s38_s13 = int_to_ptr.vmem [resolvable:$true] %s37_s13  ;;  %s23_s15 = int_to_ptr.vmem [resolvable:$true] %s22_s15 }
   0x4   :  { %s134_s16 = scalar_lea.vmem %s38_s13, 128  ;;  %p139_p1 = scmp.lt.s32.totalorder %s38_s13, %s38_s13 }
   0x5   :  { %p135_p0 = scmp.ne.s32.totalorder %s38_s13, %s134_s16  ;;  %p140_p2 = scmp.lt.s32.totalorder %s134_s16, %s134_s16 }
   0x7   :  { %p141_p3 = por %p140_p2, %p139_p1 }
   0x9   :  { %p142_p4 = pnand %p141_p3, %p135_p0 }
   0xb   :  { %145 = shalt.err (!%p142_p4)
}
   0xc   :  { %40 = dma.hbm_to_vmem [thread:$0]  %s237_s1, 128, %s38_s13, [#allocation7]  }
   0xd   :  { %s154_s19 = scalar_lea.vmem %s23_s15, 128  ;;  %p159_p6 = scmp.lt.s32.totalorder %s23_s15, %s23_s15 }
   0xe   :  { %p155_p5 = scmp.ne.s32.totalorder %s23_s15, %s154_s19  ;;  %p160_p7 = scmp.lt.s32.totalorder %s154_s19, %s154_s19 }
  0x10   :  { %p161_p8 = por %p160_p7, %p159_p6 }
  0x12   :  { %p162_p9 = pnand %p161_p8, %p155_p5 }
  0x14   :  { %165 = shalt.err (!%p162_p9)
}
  0x15   :  { %25 = dma.hbm_to_vmem [thread:$0]  %s236_s0, 128, %s23_s15, [#allocation4]  }
  0x16   :  { %s202_s22 = smov [#allocation8]  }
  0x17   :  { %s47_s23 = sshll.u32 %s202_s22, 4  ;;  %s48_s23 = int_to_ptr.vmem [resolvable:$true] %s47_s23 }
  0x18   :  { %s174_s24 = scalar_lea.vmem %s48_s23, 128  ;;  %p179_p11 = scmp.lt.s32.totalorder %s48_s23, %s48_s23 }
  0x19   :  { %p175_p10 = scmp.ne.s32.totalorder %s48_s23, %s174_s24  ;;  %p180_p12 = scmp.lt.s32.totalorder %s174_s24, %s174_s24 }
  0x1b   :  { %p181_p13 = por %p180_p12, %p179_p11 }
  0x1d   :  { %p182_p0 = pnand %p181_p13, %p175_p10 }
  0x1f   :  { %185 = shalt.err (!%p182_p0)
}
  0x20   :  { %50 = dma.hbm_to_vmem [thread:$0]  %s238_s2, 128, %s48_s23, [#allocation7]  }
  0x21   :  { %194 = dma.done.wait [#allocation4], 128  }
  0x22   :  { %195 = vsyncadd [#allocation4], 4294967168 }
  0x23   :  { %196 = dma.done.wait [#allocation7], 256  }
  0x24   :  { %197 = vsyncadd [#allocation7], 4294967040  ;;  %v76_v0 = vld [vmem:[#allocation3] sm:$0xff]  ;;  %v77_v1 = vld [vmem:[#allocation6] sm:$0xff]  ;;  %s203_s2 = smov [#allocation9]  }
  0x25   :  { %v78_v2 = vsub.f32 %v76_v0, %v77_v1  ;;  %v80_v3 = vld [vmem:[#allocation8] sm:$0xff] }
  0x27   :  { %v79_v4 = vmul.f32 %v78_v2, %v78_v2 }
  0x29   :  { %v81_v5 = vmul.f32 %v80_v3, %v79_v4 }
  0x2b   :  { %90 = vadd.xlane.f32.xlu0 %v81_v5 }
  0xb4   :  { %v91_v6 = vpop.xlane.xlu0 %90 }
  0xb5   :  { %v92_v7 = vrot.slane %v91_v6, 4 }
  0xb7   :  { %v93_v8 = vadd.f32 %v92_v7, %v91_v6 }
  0xb9   :  { %v94_v9 = vrot.slane %v93_v8, 2 }
  0xbb   :  { %v95_v10 = vadd.f32 %v94_v9, %v93_v8 }
  0xbd   :  { %v96_v11 = vrot.slane %v95_v10, 1 }
  0xbf   :  { %v97_v12 = vadd.f32 %v96_v11, %v95_v10 }
  0xc1   :  { %120 = vpush %v97_v12 }
  0xf2   :  { %s121_s0 = spop %120 }
  0xf3   :  { %100 = sst [smem:[#allocation9]] %s121_s0 }
  0xf4   :  { %108 = dma.smem_to_hbm %s203_s2, 16, %s239_s3, [#allocation5]  }
  0xf5   :  { %198 = dma.done.wait [#allocation5], 16  }
  0xf6   :  { %199 = vsyncadd [#allocation5], 4294967280 }
  0xf7   :  { %112 = sfence }
  0xf8   :  { %113 = vsyncpa [#allocation4], 1 }
  0xf9   :  { %114 = vsyncpa [#allocation7], 1 }
  0xfa   :  { %115 = vsyncpa [#allocation5], 1 }

</bundles_post_ra>
